<compile_context>
chip_gen: v7x
topology: tpu7x:2x2x1
jax: 0.10.0
libtpu: 0.0.40
codegen_flags: <defaults>
</compile_context>

<pallas_src>
import math
import functools

import jax
import jax.numpy as jnp
import numpy as np
from jax.experimental import pallas as pl
from jax.experimental.pallas import tpu as pltpu


def _round_up(x, m):
    return ((x + m - 1) // m) * m


def _fused_pairwise_kernel(eps,
                           x1_ref, x2_ref,
                           wfold_ref, w2_ref, w3_ref,
                           bias_ref, gamma_ref, beta_ref, avg_ref,
                           out_ref):
    """Packed layout: every row holds TWO batch rows side-by-side on 128 lanes."""
    # Elementwise math in f32 (v5e-safe); no-op cast when inputs are already f32.
    x1 = x1_ref[...].astype(jnp.float32)
    x2 = x2_ref[...].astype(jnp.float32)

    prod = x1 * x2
    diff = jnp.abs(x1 - x2)

    # Attended path is algebraically folded into x2 @ W_fold (see wrapper).
    # Three lane-dense MXU matmuls accumulated straight into one f32 tensor.
    z = (jnp.dot(x2, wfold_ref[...], preferred_element_type=jnp.float32)
         + jnp.dot(prod, w2_ref[...], preferred_element_type=jnp.float32)
         + jnp.dot(diff, w3_ref[...], preferred_element_type=jnp.float32)
         + bias_ref[...])

    # Segmented LayerNorm over each 64-lane half (one logical batch row each).
    # avg_ref[d, e] = 1/F if lanes d, e are in the same half, else 0, so
    # (z @ avg)[:, e] is the mean of the half containing lane e.  Biased
    # variance, matching torch.nn.LayerNorm.
    mean = jnp.dot(z, avg_ref[...], preferred_element_type=jnp.float32)
    zc = z - mean
    var = jnp.dot(zc * zc, avg_ref[...], preferred_element_type=jnp.float32)
    zn = zc * jax.lax.rsqrt(var + eps)
    fused = jnp.maximum(zn * gamma_ref[...] + beta_ref[...], 0.0)
    # TODO(synk): Dropout(0.1) is identity in eval mode; training-mode dropout
    # would need pltpu.prng_* and is intentionally not implemented here.

    out_ref[...] = fused.astype(out_ref.dtype)


def init_params(feature_dim=64, num_heads=4, seed=0):
    """Deterministic parameter init mimicking PyTorch Linear defaults."""
    key = jax.random.PRNGKey(seed)
    ks = jax.random.split(key, 12)

    def linear(kw, kb, fan_in, fan_out):
        bound = 1.0 / math.sqrt(fan_in)
        w = jax.random.uniform(kw, (fan_out, fan_in), jnp.float32, -bound, bound)
        b = jax.random.uniform(kb, (fan_out,), jnp.float32, -bound, bound)
        return w, b

    F = feature_dim
    wq, bq = linear(ks[0], ks[1], F, F)
    wk, bk = linear(ks[2], ks[3], F, F)
    wv, bv = linear(ks[4], ks[5], F, F)
    wo, bo = linear(ks[6], ks[7], F, F)
    wf, bf = linear(ks[8], ks[9], 3 * F, F)
    gamma = jnp.ones((F,), jnp.float32)
    beta = jnp.zeros((F,), jnp.float32)
    return dict(wq=wq, bq=bq, wk=wk, bk=bk, wv=wv, bv=bv,
                wo=wo, bo=bo, wf=wf, bf=bf, gamma=gamma, beta=beta)


def pairwise_attention(x1, x2, params, num_heads=4, block_rows=1024):
    """Forward pass of PairwiseAttention (eval mode). Returns (fused, attn_mean)."""
    B, F = x1.shape
    assert F % num_heads == 0
    F2 = 2 * F

    # ---- Wrapper-side algebraic fold (tiny (F,F) matmuls, constant per call) --
    # softmax over a length-1 key axis == 1  =>  attended == v_proj(x2), so the
    # fusion contribution of `attended` is
    #   ((x2 @ Wv.T + bv) @ Wo.T + bo) @ W1,  W1 = Wf[:, :F].T
    # which folds into  x2 @ W_fold + b_att.
    w1 = params["wf"][:, :F].T
    w2 = params["wf"][:, F:2 * F].T
    w3 = params["wf"][:, 2 * F:].T
    wfold = params["wv"].T @ params["wo"].T @ w1
    bias = (params["bv"] @ params["wo"].T + params["bo"]) @ w1 + params["bf"]

    # ---- Pack two batch rows per 128-lane row: block-diagonal weights ---------
    def bdiag(w):
        zero = jnp.zeros((F, F), w.dtype)
        return jnp.block([[w, zero], [zero, w]])

    wfold_bd = bdiag(wfold)
    w2_bd = bdiag(w2)
    w3_bd = bdiag(w3)
    bias2 = jnp.tile(bias, 2).reshape(1, F2)
    gamma2 = jnp.tile(params["gamma"], 2).reshape(1, F2)
    beta2 = jnp.tile(params["beta"], 2).reshape(1, F2)
    half = jnp.arange(F2) // F
    avg = (half[:, None] == half[None, :]).astype(jnp.float32) / F  # (2F, 2F)

    # ---- Batch tiling: pad to a packed-row multiple of the block size ---------
    R = _round_up(B, 2) // 2                       # packed rows needed
    TB = min(_round_up(block_rows, 8), _round_up(R, 8))  # packed rows per tile
    Rp = _round_up(R, TB)
    Bp = 2 * Rp
    if Bp != B:
        x1 = jnp.pad(x1, ((0, Bp - B), (0, 0)))
        x2 = jnp.pad(x2, ((0, Bp - B), (0, 0)))
    x1p = x1.reshape(Rp, F2)                       # contiguous reshape: free
    x2p = x2.reshape(Rp, F2)

    row_spec = pl.BlockSpec((TB, F2), lambda i: (i, 0))
    mat_spec = pl.BlockSpec((F2, F2), lambda i: (0, 0))   # resident, DMA'd once
    vec_spec = pl.BlockSpec((1, F2), lambda i: (0, 0))

    out_packed = pl.pallas_call(
        functools.partial(_fused_pairwise_kernel, 1e-5),
        out_shape=jax.ShapeDtypeStruct((Rp, F2), jnp.float32),
        grid=(Rp // TB,),
        in_specs=[row_spec, row_spec,
                  mat_spec, mat_spec, mat_spec,
                  vec_spec, vec_spec, vec_spec, mat_spec],
        out_specs=row_spec,
        compiler_params=pltpu.CompilerParams(dimension_semantics=("parallel",)),
    )(x1p, x2p, wfold_bd, w2_bd, w3_bd, bias2, gamma2, beta2, avg)

    fused = out_packed.reshape(Bp, F)[:B]
    # Softmax over a single key position is exactly 1 -> mean over heads is 1.
    attn_mean = jnp.ones((B, 1, 1), jnp.float32)
    return fused, attn_mean


def _reference(x1, x2, params, num_heads=4):
    """Pure-JAX replica of the PyTorch forward (eval mode) for validation."""
    B, F = x1.shape
    H, Dh = num_heads, F // num_heads
    scale = math.sqrt(Dh)
    lin = lambda x, w, b: x @ w.T + b
    q = lin(x1, params["wq"], params["bq"]).reshape(B, 1, H, Dh).transpose(0, 2, 1, 3)
    k = lin(x2, params["wk"], params["bk"]).reshape(B, 1, H, Dh).transpose(0, 2, 1, 3)
    v = lin(x2, params["wv"], params["bv"]).reshape(B, 1, H, Dh).transpose(0, 2, 1, 3)
    attn = jnp.einsum("bhqd,bhkd->bhqk", q, k) / scale
    attn = jax.nn.softmax(attn, axis=-1)
    attended = jnp.einsum("bhqk,bhkd->bhqd", attn, v)
    attended = attended.transpose(0, 2, 1, 3).reshape(B, -1)
    attended = lin(attended, params["wo"], params["bo"])
    cat = jnp.concatenate([attended, x1 * x2, jnp.abs(x1 - x2)], axis=-1)
    z = lin(cat, params["wf"], params["bf"])
    mean = z.mean(-1, keepdims=True)
    var = ((z - mean) ** 2).mean(-1, keepdims=True)
    z = (z - mean) / jnp.sqrt(var + 1e-5) * params["gamma"] + params["beta"]
    fused = jnp.maximum(z, 0.0)
    return fused, attn.mean(axis=1)          # (B, F), (B, 1, 1)


if __name__ == "__main__":
    B, F, H = 16, 64, 4
    key = jax.random.PRNGKey(0)
    k1, k2 = jax.random.split(key)
    x1 = jax.random.normal(k1, (B, F), jnp.float32)
    x2 = jax.random.normal(k2, (B, F), jnp.float32)

    params = init_params(feature_dim=F, num_heads=H, seed=0)

    fused, attn_mean = pairwise_attention(x1, x2, params, num_heads=H)
    jax.block_until_ready((fused, attn_mean))

    # Validate against a pure-JAX replica of the PyTorch forward.
    ref_fused, ref_attn = _reference(x1, x2, params, num_heads=H)
    assert fused.shape == (B, F) and attn_mean.shape == (B, 1, 1)
    np.testing.assert_allclose(np.asarray(fused), np.asarray(ref_fused),
                               rtol=2e-3, atol=2e-3)
    np.testing.assert_allclose(np.asarray(attn_mean), np.asarray(ref_attn),
                               rtol=1e-5, atol=1e-5)

    print("KERNEL_OK")
</pallas_src>

<mosaic_0001>
module attributes {stable_mosaic.version = 11 : i64} {
  func.func @_fused_pairwise_kernel(%arg0: i32, %arg1: memref<8x128xf32, #tpu.memory_space<vmem>>, %arg2: memref<8x128xf32, #tpu.memory_space<vmem>>, %arg3: memref<128x128xf32, #tpu.memory_space<vmem>>, %arg4: memref<128x128xf32, #tpu.memory_space<vmem>>, %arg5: memref<128x128xf32, #tpu.memory_space<vmem>>, %arg6: memref<1x128xf32, #tpu.memory_space<vmem>>, %arg7: memref<1x128xf32, #tpu.memory_space<vmem>>, %arg8: memref<1x128xf32, #tpu.memory_space<vmem>>, %arg9: memref<128x128xf32, #tpu.memory_space<vmem>>, %arg10: memref<8x128xf32, #tpu.memory_space<vmem>>) attributes {dimension_semantics = [#tpu.dimension_semantics<parallel>], iteration_bounds = array<i64: 1>, scalar_prefetch = 0 : i64, scratch_operands = 0 : i64, tpu.core_type = #tpu.core_type<tc>, window_params = [{transform_indices = @transform_0, window_bounds = array<i64: 8, 128>}, {transform_indices = @transform_1, window_bounds = array<i64: 8, 128>}, {pipeline_mode = #tpu.pipeline_mode<synchronous>, transform_indices = @transform_2, window_bounds = array<i64: 128, 128>}, {pipeline_mode = #tpu.pipeline_mode<synchronous>, transform_indices = @transform_3, window_bounds = array<i64: 128, 128>}, {pipeline_mode = #tpu.pipeline_mode<synchronous>, transform_indices = @transform_4, window_bounds = array<i64: 128, 128>}, {pipeline_mode = #tpu.pipeline_mode<synchronous>, transform_indices = @transform_5, window_bounds = array<i64: 1, 128>}, {pipeline_mode = #tpu.pipeline_mode<synchronous>, transform_indices = @transform_6, window_bounds = array<i64: 1, 128>}, {pipeline_mode = #tpu.pipeline_mode<synchronous>, transform_indices = @transform_7, window_bounds = array<i64: 1, 128>}, {pipeline_mode = #tpu.pipeline_mode<synchronous>, transform_indices = @transform_8, window_bounds = array<i64: 128, 128>}, {transform_indices = @transform_9, window_bounds = array<i64: 8, 128>}]} {
    %c0 = arith.constant 0 : index
    %c0_0 = arith.constant 0 : index
    %0 = vector.load %arg1[%c0, %c0_0] : memref<8x128xf32, #tpu.memory_space<vmem>>, vector<8x128xf32>
    %c0_1 = arith.constant 0 : index
    %c0_2 = arith.constant 0 : index
    %1 = vector.load %arg2[%c0_1, %c0_2] : memref<8x128xf32, #tpu.memory_space<vmem>>, vector<8x128xf32>
    %2 = arith.mulf %0, %1 : vector<8x128xf32>
    %3 = arith.subf %0, %1 : vector<8x128xf32>
    %4 = math.absf %3 : vector<8x128xf32>
    %c0_3 = arith.constant 0 : index
    %c0_4 = arith.constant 0 : index
    %5 = vector.load %arg3[%c0_3, %c0_4] : memref<128x128xf32, #tpu.memory_space<vmem>>, vector<128x128xf32>
    %cst = arith.constant dense<0.000000e+00> : vector<8x128xf32>
    %6 = tpu.matmul %1, %5, %cst {dimension_numbers = #tpu.dot_dimension_numbers<[1], [0], [0], [1], [0, 0, 1, 1], [], []>} : vector<8x128xf32>, vector<128x128xf32>, vector<8x128xf32> -> vector<8x128xf32>
    %c0_5 = arith.constant 0 : index
    %c0_6 = arith.constant 0 : index
    %7 = vector.load %arg4[%c0_5, %c0_6] : memref<128x128xf32, #tpu.memory_space<vmem>>, vector<128x128xf32>
    %cst_7 = arith.constant dense<0.000000e+00> : vector<8x128xf32>
    %8 = tpu.matmul %2, %7, %cst_7 {dimension_numbers = #tpu.dot_dimension_numbers<[1], [0], [0], [1], [0, 0, 1, 1], [], []>} : vector<8x128xf32>, vector<128x128xf32>, vector<8x128xf32> -> vector<8x128xf32>
    %9 = arith.addf %6, %8 : vector<8x128xf32>
    %c0_8 = arith.constant 0 : index
    %c0_9 = arith.constant 0 : index
    %10 = vector.load %arg5[%c0_8, %c0_9] : memref<128x128xf32, #tpu.memory_space<vmem>>, vector<128x128xf32>
    %cst_10 = arith.constant dense<0.000000e+00> : vector<8x128xf32>
    %11 = tpu.matmul %4, %10, %cst_10 {dimension_numbers = #tpu.dot_dimension_numbers<[1], [0], [0], [1], [0, 0, 1, 1], [], []>} : vector<8x128xf32>, vector<128x128xf32>, vector<8x128xf32> -> vector<8x128xf32>
    %12 = arith.addf %9, %11 : vector<8x128xf32>
    %c0_11 = arith.constant 0 : index
    %c0_12 = arith.constant 0 : index
    %13 = vector.load %arg6[%c0_11, %c0_12] : memref<1x128xf32, #tpu.memory_space<vmem>>, vector<1x128xf32>
    %14 = vector.broadcast %13 : vector<1x128xf32> to vector<8x128xf32>
    %15 = arith.addf %12, %14 : vector<8x128xf32>
    %c0_13 = arith.constant 0 : index
    %c0_14 = arith.constant 0 : index
    %16 = vector.load %arg9[%c0_13, %c0_14] : memref<128x128xf32, #tpu.memory_space<vmem>>, vector<128x128xf32>
    %cst_15 = arith.constant dense<0.000000e+00> : vector<8x128xf32>
    %17 = tpu.matmul %15, %16, %cst_15 {dimension_numbers = #tpu.dot_dimension_numbers<[1], [0], [0], [1], [0, 0, 1, 1], [], []>} : vector<8x128xf32>, vector<128x128xf32>, vector<8x128xf32> -> vector<8x128xf32>
    %18 = arith.subf %15, %17 : vector<8x128xf32>
    %19 = arith.mulf %18, %18 : vector<8x128xf32>
    %c0_16 = arith.constant 0 : index
    %c0_17 = arith.constant 0 : index
    %20 = vector.load %arg9[%c0_16, %c0_17] : memref<128x128xf32, #tpu.memory_space<vmem>>, vector<128x128xf32>
    %cst_18 = arith.constant dense<0.000000e+00> : vector<8x128xf32>
    %21 = tpu.matmul %19, %20, %cst_18 {dimension_numbers = #tpu.dot_dimension_numbers<[1], [0], [0], [1], [0, 0, 1, 1], [], []>} : vector<8x128xf32>, vector<128x128xf32>, vector<8x128xf32> -> vector<8x128xf32>
    %cst_19 = arith.constant 9.99999974E-6 : f32
    %22 = vector.broadcast %cst_19 : f32 to vector<8x128xf32>
    %23 = arith.addf %21, %22 : vector<8x128xf32>
    %24 = math.rsqrt %23 : vector<8x128xf32>
    %25 = arith.mulf %18, %24 : vector<8x128xf32>
    %c0_20 = arith.constant 0 : index
    %c0_21 = arith.constant 0 : index
    %26 = vector.load %arg7[%c0_20, %c0_21] : memref<1x128xf32, #tpu.memory_space<vmem>>, vector<1x128xf32>
    %27 = vector.broadcast %26 : vector<1x128xf32> to vector<8x128xf32>
    %28 = arith.mulf %25, %27 : vector<8x128xf32>
    %c0_22 = arith.constant 0 : index
    %c0_23 = arith.constant 0 : index
    %29 = vector.load %arg8[%c0_22, %c0_23] : memref<1x128xf32, #tpu.memory_space<vmem>>, vector<1x128xf32>
    %30 = vector.broadcast %29 : vector<1x128xf32> to vector<8x128xf32>
    %31 = arith.addf %28, %30 : vector<8x128xf32>
    %cst_24 = arith.constant 0.000000e+00 : f32
    %32 = vector.broadcast %cst_24 : f32 to vector<8x128xf32>
    %33 = arith.maximumf %31, %32 : vector<8x128xf32>
    %c0_25 = arith.constant 0 : index
    %c0_26 = arith.constant 0 : index
    %34 = vector.load %arg10[%c0_25, %c0_26] : memref<8x128xf32, #tpu.memory_space<vmem>>, vector<8x128xf32>
    tpu.vector_store %arg10[%c0_25, %c0_26], %33 {strides = array<i32>} : memref<8x128xf32, #tpu.memory_space<vmem>>, vector<8x128xf32>,
    return
  }
  func.func @transform_0(%arg0: i32) -> (i32, i32) {
    %c0_i32 = arith.constant 0 : i32
    %c0_i32_0 = arith.constant 0 : i32
    return %arg0, %c0_i32 : i32, i32
  }
  func.func @transform_1(%arg0: i32) -> (i32, i32) {
    %c0_i32 = arith.constant 0 : i32
    %c0_i32_0 = arith.constant 0 : i32
    return %arg0, %c0_i32 : i32, i32
  }
  func.func @transform_2(%arg0: i32) -> (i32, i32) {
    %c0_i32 = arith.constant 0 : i32
    %c0_i32_0 = arith.constant 0 : i32
    %c0_i32_1 = arith.constant 0 : i32
    return %c0_i32, %c0_i32_0 : i32, i32
  }
  func.func @transform_3(%arg0: i32) -> (i32, i32) {
    %c0_i32 = arith.constant 0 : i32
    %c0_i32_0 = arith.constant 0 : i32
    %c0_i32_1 = arith.constant 0 : i32
    return %c0_i32, %c0_i32_0 : i32, i32
  }
  func.func @transform_4(%arg0: i32) -> (i32, i32) {
    %c0_i32 = arith.constant 0 : i32
    %c0_i32_0 = arith.constant 0 : i32
    %c0_i32_1 = arith.constant 0 : i32
    return %c0_i32, %c0_i32_0 : i32, i32
  }
  func.func @transform_5(%arg0: i32) -> (i32, i32) {
    %c0_i32 = arith.constant 0 : i32
    %c0_i32_0 = arith.constant 0 : i32
    %c0_i32_1 = arith.constant 0 : i32
    return %c0_i32, %c0_i32_0 : i32, i32
  }
  func.func @transform_6(%arg0: i32) -> (i32, i32) {
    %c0_i32 = arith.constant 0 : i32
    %c0_i32_0 = arith.constant 0 : i32
    %c0_i32_1 = arith.constant 0 : i32
    return %c0_i32, %c0_i32_0 : i32, i32
  }
  func.func @transform_7(%arg0: i32) -> (i32, i32) {
    %c0_i32 = arith.constant 0 : i32
    %c0_i32_0 = arith.constant 0 : i32
    %c0_i32_1 = arith.constant 0 : i32
    return %c0_i32, %c0_i32_0 : i32, i32
  }
  func.func @transform_8(%arg0: i32) -> (i32, i32) {
    %c0_i32 = arith.constant 0 : i32
    %c0_i32_0 = arith.constant 0 : i32
    %c0_i32_1 = arith.constant 0 : i32
    return %c0_i32, %c0_i32_0 : i32, i32
  }
  func.func @transform_9(%arg0: i32) -> (i32, i32) {
    %c0_i32 = arith.constant 0 : i32
    %c0_i32_0 = arith.constant 0 : i32
    return %arg0, %c0_i32 : i32, i32
  }
}

</mosaic_0001>

<bundles_post_ra>
// kernel: tpu_custom_call.1
= control target key start
LH: loop header
LB: loop body
LE: loop exit
PB: predicated region body
PF: predicated region fallthrough
CT: control target
= control target key end

     0   :  { %14 = vsyncpa [#allocation3], 0  ;;  %s1357_s0 = inlined_call_operand.hbm [shape: f32[8,128], index: 0, kind: input, shape index: {}]   ;;  %s1358_s1 = inlined_call_operand.hbm [shape: f32[8,128], index: 1, kind: input, shape index: {}]   ;;  %s1359_s2 = inlined_call_operand.hbm [shape: f32[128,128], index: 2, kind: input, shape index: {}]   ;;  %s1360_s3 = inlined_call_operand.hbm [shape: f32[128,128], index: 3, kind: input, shape index: {}]   ;;  %s1361_s4 = inlined_call_operand.hbm [shape: f32[128,128], index: 4, kind: input, shape index: {}]   ;;  %s1362_s5 = inlined_call_operand.vmem [shape: f32[1,128], index: 5, kind: input, shape index: {}]   ;;  %s1363_s6 = inlined_call_operand.vmem [shape: f32[1,128], index: 6, kind: input, shape index: {}]   ;;  %s1364_s7 = inlined_call_operand.vmem [shape: f32[1,128], index: 7, kind: input, shape index: {}]   ;;  %s1365_s8 = inlined_call_operand.hbm [shape: f32[128,128], index: 8, kind: input, shape index: {}]   ;;  %s1366_s9 = inlined_call_operand.hbm [shape: f32[8,128], index: 9, kind: output, shape index: {}]  }
   0x1   :  { %15 = vsyncpa [#allocation6], 0 }
   0x2   :  { %16 = vsyncpa [#allocation9], 0 }
   0x3   :  { %17 = vsyncpa [#allocation12], 0 }
   0x4   :  { %18 = vsyncpa [#allocation4], 0  ;;  %s1140_s30 = smov [#allocation5]   ;;  %s976_s13 = scalar_lea.hbm %s1358_s1, 128 }
   0x5   :  { %s35_s10 = sshll.u32 %s1140_s30, 4  ;;  %p977_p0 = scmp.ne.s32.totalorder %s1358_s1, %s976_s13  ;;  %s36_s10 = int_to_ptr.vmem [resolvable:$true] %s35_s10 }
   0x6   :  { %p980_p1 = scmp.lt.u32.totalorder %s976_s13, %s1358_s1 }
   0x8   :  { %p982_p2 = pnand %p980_p1, %p977_p0 }
   0xa   :  { %985 = shalt.err (!%p982_p2)
}
   0xb   :  { %s986_s18 = scalar_lea.vmem %s36_s10, 128  ;;  %p991_p4 = scmp.lt.s32.totalorder %s36_s10, %s36_s10 }
   0xc   :  { %p987_p3 = scmp.ne.s32.totalorder %s36_s10, %s986_s18  ;;  %p992_p5 = scmp.lt.s32.totalorder %s986_s18, %s986_s18 }
   0xe   :  { %p993_p6 = por %p992_p5, %p991_p4 }
  0x10   :  { %p994_p7 = pnand %p993_p6, %p987_p3 }
  0x12   :  { %997 = shalt.err (!%p994_p7)
}
  0x13   :  { %38 = dma.hbm_to_vmem [thread:$0]  %s1358_s1, 128, %s36_s10, [#allocation6]  }
  0x14   :  { %s1141_s21 = smov [#allocation8]   ;;  %s1142_s23 = smov [#allocation2]  }
  0x15   :  { %s56_s22 = sshll.u32 %s1141_s21, 4  ;;  %s25_s24 = sshll.u32 %s1142_s23, 4  ;;  %s57_s22 = int_to_ptr.vmem [resolvable:$true] %s56_s22  ;;  %s26_s24 = int_to_ptr.vmem [resolvable:$true] %s25_s24 }
  0x16   :  { %s998_s27 = scalar_lea.hbm %s1360_s3, 2048 }
  0x17   :  { %p999_p8 = scmp.ne.s32.totalorder %s1360_s3, %s998_s27  ;;  %p1002_p9 = scmp.lt.u32.totalorder %s998_s27, %s1360_s3 }
  0x19   :  { %p1004_p10 = pnand %p1002_p9, %p999_p8 }
  0x1b   :  { %1007 = shalt.err (!%p1004_p10)
}
  0x1c   :  { %s1008_s1 = scalar_lea.vmem %s57_s22, 2048  ;;  %p1013_p12 = scmp.lt.s32.totalorder %s57_s22, %s57_s22 }
  0x1d   :  { %p1009_p11 = scmp.ne.s32.totalorder %s57_s22, %s1008_s1  ;;  %p1014_p13 = scmp.lt.s32.totalorder %s1008_s1, %s1008_s1 }
  0x1f   :  { %p1015_p0 = por %p1014_p13, %p1013_p12 }
  0x21   :  { %p1016_p1 = pnand %p1015_p0, %p1009_p11 }
  0x23   :  { %1019 = shalt.err (!%p1016_p1)
}
  0x24   :  { %s1143_s10 = smov 128   ;;  %s1144_s12 = smov 8  }
  0x25   :  { %62 = dma.hbm_to_vmem [thread:$0]  %s1360_s3, 2048, %s57_s22, [#allocation9], %s1143_s10, %s1143_s10, %s1144_s12  }
  0x26   :  { %s1020_s17 = scalar_lea.hbm %s1357_s0, 128 }
  0x27   :  { %p1021_p2 = scmp.ne.s32.totalorder %s1357_s0, %s1020_s17  ;;  %p1024_p3 = scmp.lt.u32.totalorder %s1020_s17, %s1357_s0 }
  0x29   :  { %p1026_p4 = pnand %p1024_p3, %p1021_p2 }
  0x2b   :  { %1029 = shalt.err (!%p1026_p4)
}
  0x2c   :  { %s1030_s23 = scalar_lea.vmem %s26_s24, 128  ;;  %p1035_p6 = scmp.lt.s32.totalorder %s26_s24, %s26_s24 }
  0x2d   :  { %p1031_p5 = scmp.ne.s32.totalorder %s26_s24, %s1030_s23  ;;  %p1036_p7 = scmp.lt.s32.totalorder %s1030_s23, %s1030_s23 }
  0x2f   :  { %p1037_p8 = por %p1036_p7, %p1035_p6 }
  0x31   :  { %p1038_p9 = pnand %p1037_p8, %p1031_p5 }
  0x33   :  { %1041 = shalt.err (!%p1038_p9)
}
  0x34   :  { %28 = dma.hbm_to_vmem [thread:$0]  %s1357_s0, 128, %s26_s24, [#allocation3]  }
  0x35   :  { %s1145_s25 = smov [#allocation7]   ;;  %s1146_s27 = smov [#allocation10]  }
  0x36   :  { %s44_s26 = sshll.u32 %s1145_s25, 4  ;;  %s68_s28 = sshll.u32 %s1146_s27, 4  ;;  %s45_s26 = int_to_ptr.vmem [resolvable:$true] %s44_s26  ;;  %s69_s28 = int_to_ptr.vmem [resolvable:$true] %s68_s28 }
  0x37   :  { %s1042_s11 = scalar_lea.hbm %s1359_s2, 2048 }
  0x38   :  { %p1043_p10 = scmp.ne.s32.totalorder %s1359_s2, %s1042_s11  ;;  %p1046_p11 = scmp.lt.u32.totalorder %s1042_s11, %s1359_s2 }
  0x3a   :  { %p1048_p12 = pnand %p1046_p11, %p1043_p10 }
  0x3c   :  { %1051 = shalt.err (!%p1048_p12)
}
  0x3d   :  { %s1052_s0 = scalar_lea.vmem %s45_s26, 2048  ;;  %p1057_p0 = scmp.lt.s32.totalorder %s45_s26, %s45_s26 }
  0x3e   :  { %p1053_p13 = scmp.ne.s32.totalorder %s45_s26, %s1052_s0  ;;  %p1058_p1 = scmp.lt.s32.totalorder %s1052_s0, %s1052_s0 }
  0x40   :  { %p1059_p2 = por %p1058_p1, %p1057_p0 }
  0x42   :  { %p1060_p3 = pnand %p1059_p2, %p1053_p13 }
  0x44   :  { %1063 = shalt.err (!%p1060_p3)
}
  0x45   :  { %50 = dma.hbm_to_vmem [thread:$0]  %s1359_s2, 2048, %s45_s26, [#allocation6], %s1143_s10, %s1143_s10, %s1144_s12  }
  0x46   :  { %s1064_s19 = scalar_lea.hbm %s1361_s4, 2048 }
  0x47   :  { %p1065_p4 = scmp.ne.s32.totalorder %s1361_s4, %s1064_s19  ;;  %p1068_p5 = scmp.lt.u32.totalorder %s1064_s19, %s1361_s4 }
  0x49   :  { %p1070_p6 = pnand %p1068_p5, %p1065_p4 }
  0x4b   :  { %1073 = shalt.err (!%p1070_p6)
}
  0x4c   :  { %s1074_s22 = scalar_lea.vmem %s69_s28, 2048  ;;  %p1079_p8 = scmp.lt.s32.totalorder %s69_s28, %s69_s28 }
  0x4d   :  { %p1075_p7 = scmp.ne.s32.totalorder %s69_s28, %s1074_s22  ;;  %p1080_p9 = scmp.lt.s32.totalorder %s1074_s22, %s1074_s22 }
  0x4f   :  { %p1081_p10 = por %p1080_p9, %p1079_p8 }
  0x51   :  { %p1082_p11 = pnand %p1081_p10, %p1075_p7 }
  0x53   :  { %1085 = shalt.err (!%p1082_p11)
}
  0x54   :  { %74 = dma.hbm_to_vmem [thread:$0]  %s1361_s4, 2048, %s69_s28, [#allocation9], %s1143_s10, %s1143_s10, %s1144_s12  }
  0x55   :  { %s1147_s26 = smov [#allocation11]   ;;  %s1086_s11 = scalar_lea.hbm %s1365_s8, 2048 }
  0x56   :  { %s86_s27 = sshll.u32 %s1147_s26, 4  ;;  %p1087_p12 = scmp.ne.s32.totalorder %s1365_s8, %s1086_s11  ;;  %s87_s27 = int_to_ptr.vmem [resolvable:$true] %s86_s27 }
  0x57   :  { %p1090_p13 = scmp.lt.u32.totalorder %s1086_s11, %s1365_s8 }
  0x59   :  { %p1092_p0 = pnand %p1090_p13, %p1087_p12 }
  0x5b   :  { %1095 = shalt.err (!%p1092_p0)
}
  0x5c   :  { %s1096_s0 = scalar_lea.vmem %s87_s27, 2048  ;;  %p1101_p2 = scmp.lt.s32.totalorder %s87_s27, %s87_s27 }
  0x5d   :  { %p1097_p1 = scmp.ne.s32.totalorder %s87_s27, %s1096_s0  ;;  %p1102_p3 = scmp.lt.s32.totalorder %s1096_s0, %s1096_s0 }
  0x5f   :  { %p1103_p4 = por %p1102_p3, %p1101_p2 }
  0x61   :  { %p1104_p5 = pnand %p1103_p4, %p1097_p1 }
  0x63   :  { %1107 = shalt.err (!%p1104_p5)
}
  0x64   :  { %92 = dma.hbm_to_vmem [thread:$0]  %s1365_s8, 2048, %s87_s27, [#allocation12], %s1143_s10, %s1143_s10, %s1144_s12  }
  0x65   :  { %1130 = dma.done.wait [#allocation3], 128  }
  0x66   :  { %1131 = vsyncadd [#allocation3], 4294967168 }
  0x67   :  { %1132 = dma.done.wait [#allocation6], 2176  }
  0x68   :  { %1133 = vsyncadd [#allocation6], 4294965120 }
  0x69   :  { %1134 = dma.done.wait [#allocation9], 4096  }
  0x6a   :  { %1135 = vsyncadd [#allocation9], 4294963200 }
  0x6b   :  { %1136 = dma.done.wait [#allocation12], 2048  }
  0x6c   :  { %1137 = vsyncadd [#allocation12], 4294965248  ;;  %v1148_v0 = vmov 0.0|0.0   ;;  %vm1149_vm0 = vmmov 0   ;;  %v1150_v1 = vmov 0.0   ;;  %v132_v2 = vld [vmem:[#allocation8] sm:$0xff] }
  0x6d   :  { %842 = vmatprep.subr.bf16.mxu0 %v1148_v0  ;;  %866 = vmatprep.subr.bf16.mxu1 %v1148_v0  ;;  %v133_v3 = vld [vmem:[#allocation8 + $0x8] sm:$0xff]  ;;  %v116_v4 = vld [vmem:[#allocation7] sm:$0xff]  ;;  %v134_v7 = vld [vmem:[#allocation8 + $0x10] sm:$0xff]  ;;  %s1151_s17 = smov [#allocation13]  }
  0x6e   :  { %699 = vmatprep.mubr.msk.f32.mxu0 %vm1149_vm0, %v1150_v1  ;;  %734 = vmatprep.mubr.msk.f32.mxu1 %vm1149_vm0, %v1150_v1  ;;  %v843_v5 = vpack.c.bf16 %v133_v3, %v132_v2  ;;  %v117_v6 = vld [vmem:[#allocation7 + $0x8] sm:$0xff]  ;;  %v135_v8 = vld [vmem:[#allocation8 + $0x18] sm:$0xff]  ;;  %v118_v10 = vld [vmem:[#allocation7 + $0x10] sm:$0xff]  ;;  %s567_s18 = sshll.u32 %s1151_s17, 4  ;;  %s568_s18 = int_to_ptr.vmem [resolvable:$true] %s567_s18 }
  0x6f   :  { %v867_v9 = vpack.c.bf16 %v117_v6, %v116_v4  ;;  %v119_v11 = vld [vmem:[#allocation7 + $0x18] sm:$0xff]  ;;  %v846_v12 = vpack.c.bf16 %v135_v8, %v134_v7  ;;  %v136_v14 = vld [vmem:[#allocation8 + $0x20] sm:$0xff]  ;;  %v137_v15 = vld [vmem:[#allocation8 + $0x28] sm:$0xff]  ;;  %s1108_s19 = scalar_lea.vmem %s568_s18, 128  ;;  %p1113_p7 = scmp.lt.s32.totalorder %s568_s18, %s568_s18 }
  0x70   :  { %844 = vmatpush3.bf16.msra.mxu0 %v843_v5  ;;  %v870_v13 = vpack.c.bf16 %v119_v11, %v118_v10  ;;  %v120_v16 = vld [vmem:[#allocation7 + $0x20] sm:$0xff]  ;;  %v121_v17 = vld [vmem:[#allocation7 + $0x28] sm:$0xff]  ;;  %v849_v18 = vpack.c.bf16 %v137_v15, %v136_v14  ;;  %v138_v20 = vld [vmem:[#allocation8 + $0x30] sm:$0xff]  ;;  %p1109_p6 = scmp.ne.s32.totalorder %s568_s18, %s1108_s19  ;;  %p1114_p8 = scmp.lt.s32.totalorder %s1108_s19, %s1108_s19 }
  0x71   :  { %868 = vmatpush3.bf16.msra.mxu1 %v867_v9  ;;  %845 = vmatprep.subr.bf16.mxu0 %v1148_v0  ;;  %v873_v19 = vpack.c.bf16 %v121_v17, %v120_v16  ;;  %v139_v21 = vld [vmem:[#allocation8 + $0x38] sm:$0xff]  ;;  %v122_v22 = vld [vmem:[#allocation7 + $0x30] sm:$0xff]  ;;  %v140_v26 = vld [vmem:[#allocation8 + $0x40] sm:$0xff] }
  0x72   :  { %869 = vmatprep.subr.bf16.mxu1 %v1148_v0  ;;  %v123_v23 = vld [vmem:[#allocation7 + $0x38] sm:$0xff]  ;;  %v852_v24 = vpack.c.bf16 %v139_v21, %v138_v20  ;;  %v141_v27 = vld [vmem:[#allocation8 + $0x48] sm:$0xff]  ;;  %v124_v28 = vld [vmem:[#allocation7 + $0x40] sm:$0xff]  ;;  %p1115_p9 = por %p1114_p8, %p1113_p7 }
  0x73   :  { %v876_v25 = vpack.c.bf16 %v123_v23, %v122_v22  ;;  %v125_v29 = vld [vmem:[#allocation7 + $0x48] sm:$0xff]  ;;  %v855_v30 = vpack.c.bf16 %v141_v27, %v140_v26  ;;  %v142_v32 = vld [vmem:[#allocation8 + $0x50] sm:$0xff]  ;;  %v143_v33 = vld [vmem:[#allocation8 + $0x58] sm:$0xff] }
  0x74   :  { %847 = vmatpush3.bf16.msra.mxu0 %v846_v12  ;;  %v879_v31 = vpack.c.bf16 %v125_v29, %v124_v28  ;;  %v126_v34 = vld [vmem:[#allocation7 + $0x50] sm:$0xff]  ;;  %v127_v35 = vld [vmem:[#allocation7 + $0x58] sm:$0xff]  ;;  %v858_v36 = vpack.c.bf16 %v143_v33, %v142_v32  ;;  %v144_v38 = vld [vmem:[#allocation8 + $0x60] sm:$0xff]  ;;  %p1116_p10 = pnand %p1115_p9, %p1109_p6 }
  0x75   :  { %871 = vmatpush3.bf16.msra.mxu1 %v870_v13  ;;  %848 = vmatprep.subr.bf16.mxu0 %v1148_v0  ;;  %v882_v37 = vpack.c.bf16 %v127_v35, %v126_v34  ;;  %v145_v39 = vld [vmem:[#allocation8 + $0x68] sm:$0xff]  ;;  %v128_v40 = vld [vmem:[#allocation7 + $0x60] sm:$0xff]  ;;  %v146_v44 = vld [vmem:[#allocation8 + $0x70] sm:$0xff] }
  0x76   :  { %872 = vmatprep.subr.bf16.mxu1 %v1148_v0  ;;  %v129_v41 = vld [vmem:[#allocation7 + $0x68] sm:$0xff]  ;;  %v861_v42 = vpack.c.bf16 %v145_v39, %v144_v38  ;;  %v147_v45 = vld [vmem:[#allocation8 + $0x78] sm:$0xff]  ;;  %v130_v46 = vld [vmem:[#allocation7 + $0x70] sm:$0xff] }
  0x77   :  { %v885_v43 = vpack.c.bf16 %v129_v41, %v128_v40  ;;  %v131_v47 = vld [vmem:[#allocation7 + $0x78] sm:$0xff]  ;;  %v864_v48 = vpack.c.bf16 %v147_v45, %v146_v44  ;;  %v111_v49 = vld [vmem:[#allocation2] sm:$0xff]  ;;  %v288_v52 = vld [vmem:[#allocation10] sm:$0xff] }
  0x78   :  { %850 = vmatpush3.bf16.msra.mxu0 %v849_v18  ;;  %v112_v50 = vld [vmem:[#allocation5] sm:$0xff]  ;;  %v888_v51 = vpack.c.bf16 %v131_v47, %v130_v46  ;;  %v289_v53 = vld [vmem:[#allocation10 + $0x8] sm:$0xff]  ;;  %v290_v56 = vld [vmem:[#allocation10 + $0x10] sm:$0xff] }
  0x79   :  { %874 = vmatpush3.bf16.msra.mxu1 %v873_v19  ;;  %851 = vmatprep.subr.bf16.mxu0 %v1148_v0  ;;  %v113_v54 = vmul.f32 %v112_v50, %v111_v49  ;;  %v891_v55 = vpack.c.bf16 %v289_v53, %v288_v52  ;;  %v291_v57 = vld [vmem:[#allocation10 + $0x18] sm:$0xff]  ;;  %v292_v59 = vld [vmem:[#allocation10 + $0x20] sm:$0xff]  ;;  %v293_v60 = vld [vmem:[#allocation10 + $0x28] sm:$0xff]  ;;  %v114_v14 = vsub.f32 %v111_v49, %v112_v50 }
  0x7a   :  { %875 = vmatprep.subr.bf16.mxu1 %v1148_v0  ;;  %v894_v58 = vpack.c.bf16 %v291_v57, %v290_v56  ;;  %v897_v61 = vpack.c.bf16 %v293_v60, %v292_v59  ;;  %v294_v62 = vld [vmem:[#allocation10 + $0x30] sm:$0xff]  ;;  %v295_v63 = vld [vmem:[#allocation10 + $0x38] sm:$0xff]  ;;  %v296_v3 = vld [vmem:[#allocation10 + $0x40] sm:$0xff] }
  0x7b   :  { %v900_v2 = vpack.c.bf16 %v295_v63, %v294_v62  ;;  %v297_v4 = vld [vmem:[#allocation10 + $0x48] sm:$0xff]  ;;  %v298_v6 = vld [vmem:[#allocation10 + $0x50] sm:$0xff]  ;;  %v299_v7 = vld [vmem:[#allocation10 + $0x58] sm:$0xff]  ;;  %v115_v16 = vand.u32 2147483647, %v114_v14 }
  0x7c   :  { %853 = vmatpush3.bf16.msra.mxu0 %v852_v24  ;;  %v903_v5 = vpack.c.bf16 %v297_v4, %v296_v3  ;;  %v906_v8 = vpack.c.bf16 %v299_v7, %v298_v6  ;;  %v300_v9 = vld [vmem:[#allocation10 + $0x60] sm:$0xff]  ;;  %v301_v10 = vld [vmem:[#allocation10 + $0x68] sm:$0xff]  ;;  %v302_v12 = vld [vmem:[#allocation10 + $0x70] sm:$0xff] }
  0x7d   :  { %877 = vmatpush3.bf16.msra.mxu1 %v876_v25  ;;  %854 = vmatprep.subr.bf16.mxu0 %v1148_v0  ;;  %v909_v11 = vpack.c.bf16 %v301_v10, %v300_v9  ;;  %v303_v13 = vld [vmem:[#allocation10 + $0x78] sm:$0xff]  ;;  %v383_v17 = vld [vmem:[#allocation11] sm:$0xff]  ;;  %v384_v18 = vld [vmem:[#allocation11 + $0x8] sm:$0xff] }
  0x7e   :  { %878 = vmatprep.subr.bf16.mxu1 %v1148_v0  ;;  %v912_v15 = vpack.c.bf16 %v303_v13, %v302_v12  ;;  %v385_v19 = vld [vmem:[#allocation11 + $0x10] sm:$0xff]  ;;  %v915_v20 = vpack.c.bf16 %v384_v18, %v383_v17  ;;  %v386_v21 = vld [vmem:[#allocation11 + $0x18] sm:$0xff]  ;;  %v387_v23 = vld [vmem:[#allocation11 + $0x20] sm:$0xff] }
  0x7f   :  { %v918_v22 = vpack.c.bf16 %v386_v21, %v385_v19  ;;  %v388_v24 = vld [vmem:[#allocation11 + $0x28] sm:$0xff]  ;;  %v390_v26 = vld [vmem:[#allocation11 + $0x38] sm:$0xff]  ;;  %v391_v28 = vld [vmem:[#allocation11 + $0x40] sm:$0xff] }
  0x80   :  { %856 = vmatpush3.bf16.msra.mxu0 %v855_v30  ;;  %v921_v25 = vpack.c.bf16 %v388_v24, %v387_v23  ;;  %v392_v29 = vld [vmem:[#allocation11 + $0x48] sm:$0xff]  ;;  %v394_v32 = vld [vmem:[#allocation11 + $0x58] sm:$0xff]  ;;  %v395_v34 = vld [vmem:[#allocation11 + $0x60] sm:$0xff] }
  0x81   :  { %880 = vmatpush3.bf16.msra.mxu1 %v879_v31  ;;  %857 = vmatprep.subr.bf16.mxu0 %v1148_v0  ;;  %v927_v30 = vpack.c.bf16 %v392_v29, %v391_v28  ;;  %v393_v31 = vld [vmem:[#allocation11 + $0x50] sm:$0xff]  ;;  %v396_v35 = vld [vmem:[#allocation11 + $0x68] sm:$0xff]  ;;  %v398_v38 = vld [vmem:[#allocation11 + $0x78] sm:$0xff] }
  0x82   :  { %881 = vmatprep.subr.bf16.mxu1 %v1148_v0  ;;  %v930_v33 = vpack.c.bf16 %v394_v32, %v393_v31  ;;  %v579_v46 = vld [vmem:[%s1362_s5] ss:$0 sm:$0xff] }
  0x83   :  { %v580_v57 = vld [vmem:[%s1363_s6] ss:$0 sm:$0xff] }
  0x84   :  { %859 = vmatpush3.bf16.msra.mxu0 %v858_v36  ;;  %v933_v36 = vpack.c.bf16 %v396_v35, %v395_v34  ;;  %v581_v59 = vld [vmem:[%s1364_s7] ss:$0 sm:$0xff] }
  0x85   :  { %883 = vmatpush3.bf16.msra.mxu1 %v882_v37  ;;  %860 = vmatprep.subr.bf16.mxu0 %v1148_v0  ;;  %v397_v37 = vld [vmem:[#allocation11 + $0x70] sm:$0xff] }
  0x86   :  { %884 = vmatprep.subr.bf16.mxu1 %v1148_v0  ;;  %v936_v39 = vpack.c.bf16 %v398_v38, %v397_v37 }
  0x88   :  { %862 = vmatpush3.bf16.msra.mxu0 %v861_v42 }
  0x89   :  { %886 = vmatpush3.bf16.msra.mxu1 %v885_v43  ;;  %863 = vmatprep.subr.bf16.mxu0 %v1148_v0 }
  0x8a   :  { %887 = vmatprep.subr.bf16.mxu1 %v1148_v0 }
  0x8c   :  { %865 = vmatpush3.bf16.msra.mxu0 %v864_v48 }
  0x8d   :  { %889 = vmatpush3.bf16.msra.mxu1 %v888_v51  ;;  %890 = vmatprep.subr.bf16.mxu0 %v1148_v0 }
  0x8e   :  { %914 = vmatprep.subr.bf16.mxu1 %v1148_v0 }
  0x8f   :  { %700 = vmatmul.mubr.f32.vlgmr.msra.gmra.mrb[0].mxu0 %v113_v54 }
  0x90   :  { %735 = vmatmul.mubr.f32.vlgmr.msra.gmra.mrb[0].mxu1 %v112_v50  ;;  %892 = vmatpush3.bf16.msra.mxu0 %v891_v55 }
  0x91   :  { %893 = vmatprep.subr.bf16.mxu0 %v1148_v0  ;;  %769 = vmatprep.mubr.msk.f32.mxu0 %vm1149_vm0, %v1150_v1 }
  0x92   :  { %804 = vmatprep.mubr.msk.f32.mxu1 %vm1149_vm0, %v1150_v1  ;;  %916 = vmatpush3.bf16.msra.mxu1 %v915_v20 }
  0x93   :  { %917 = vmatprep.subr.bf16.mxu1 %v1148_v0 }
  0x94   :  { %895 = vmatpush3.bf16.msra.mxu0 %v894_v58 }
  0x95   :  { %896 = vmatprep.subr.bf16.mxu0 %v1148_v0 }
  0x96   :  { %919 = vmatpush3.bf16.msra.mxu1 %v918_v22 }
  0x97   :  { %920 = vmatprep.subr.bf16.mxu1 %v1148_v0 }
  0x98   :  { %898 = vmatpush3.bf16.msra.mxu0 %v897_v61 }
  0x99   :  { %899 = vmatprep.subr.bf16.mxu0 %v1148_v0 }
  0x9a   :  { %922 = vmatpush3.bf16.msra.mxu1 %v921_v25 }
  0x9b   :  { %923 = vmatprep.subr.bf16.mxu1 %v1148_v0 }
  0x9c   :  { %901 = vmatpush3.bf16.msra.mxu0 %v900_v2 }
  0x9d   :  { %902 = vmatprep.subr.bf16.mxu0 %v1148_v0 }
  0xa0   :  { %904 = vmatpush3.bf16.msra.mxu0 %v903_v5 }
  0xa1   :  { %905 = vmatprep.subr.bf16.mxu0 %v1148_v0 }
  0xa4   :  { %907 = vmatpush3.bf16.msra.mxu0 %v906_v8 }
  0xa5   :  { %908 = vmatprep.subr.bf16.mxu0 %v1148_v0 }
  0xa8   :  { %910 = vmatpush3.bf16.msra.mxu0 %v909_v11 }
  0xa9   :  { %911 = vmatprep.subr.bf16.mxu0 %v1148_v0 }
  0xac   :  { %913 = vmatpush3.bf16.msra.mxu0 %v912_v15 }
  0xad   :  { %938 = vmatprep.subr.bf16.mxu0 %v1148_v0 }
  0xaf   :  { %770 = vmatmul.mubr.f32.vlgmr.msra.gmra.mrb[2].mxu0 %v115_v16 }
  0xb0   :  { %839 = vmatprep.mubr.msk.f32.mxu0 %vm1149_vm0, %v1150_v1  ;;  %940 = vmatpush3.bf16.msra.mxu0 %v915_v20  ;;  %v389_v1 = vld [vmem:[#allocation11 + $0x30] sm:$0xff] }
  0xb1   :  { %941 = vmatprep.subr.bf16.mxu0 %v1148_v0  ;;  %v924_v27 = vpack.c.bf16 %v390_v26, %v389_v1 }
  0xb3   :  { %925 = vmatpush3.bf16.msra.mxu1 %v924_v27 }
  0xb4   :  { %943 = vmatpush3.bf16.msra.mxu0 %v918_v22  ;;  %926 = vmatprep.subr.bf16.mxu1 %v1148_v0 }
  0xb5   :  { %944 = vmatprep.subr.bf16.mxu0 %v1148_v0 }
  0xb7   :  { %928 = vmatpush3.bf16.msra.mxu1 %v927_v30 }
  0xb8   :  { %946 = vmatpush3.bf16.msra.mxu0 %v921_v25  ;;  %929 = vmatprep.subr.bf16.mxu1 %v1148_v0 }
  0xb9   :  { %947 = vmatprep.subr.bf16.mxu0 %v1148_v0 }
  0xbb   :  { %931 = vmatpush3.bf16.msra.mxu1 %v930_v33 }
  0xbc   :  { %949 = vmatpush3.bf16.msra.mxu0 %v924_v27  ;;  %932 = vmatprep.subr.bf16.mxu1 %v1148_v0 }
  0xbd   :  { %950 = vmatprep.subr.bf16.mxu0 %v1148_v0 }
  0xbf   :  { %934 = vmatpush3.bf16.msra.mxu1 %v933_v36 }
  0xc0   :  { %952 = vmatpush3.bf16.msra.mxu0 %v927_v30  ;;  %935 = vmatprep.subr.bf16.mxu1 %v1148_v0 }
  0xc1   :  { %953 = vmatprep.subr.bf16.mxu0 %v1148_v0 }
  0xc3   :  { %937 = vmatpush3.bf16.msra.mxu1 %v936_v39 }
  0xc4   :  { %955 = vmatpush3.bf16.msra.mxu0 %v930_v33 }
  0xc5   :  { %956 = vmatprep.subr.bf16.mxu0 %v1148_v0 }
  0xc8   :  { %958 = vmatpush3.bf16.msra.mxu0 %v933_v36 }
  0xc9   :  { %959 = vmatprep.subr.bf16.mxu0 %v1148_v0 }
  0xcc   :  { %961 = vmatpush3.bf16.msra.mxu0 %v936_v39 }
 0x162   :  { %v214_v40 = vpop.f32.mrb[0].mxu0 }
 0x163   :  { %v701_v41 = vpop.f32.mrb[1].mxu0  ;;  %v284_v42 = vpop.f32.mrb[0].mxu1 }
 0x164   :  { %v285_v43 = vadd.f32 %v284_v42, %v214_v40  ;;  %v736_v44 = vpop.f32.mrb[1].mxu1 }
 0x182   :  { %v370_v45 = vpop.f32.mrb[2].mxu0 }
 0x183   :  { %v374_v47 = vadd.f32 %v370_v45, %v285_v43  ;;  %v771_v48 = vpop.f32.mrb[3].mxu0 }
 0x185   :  { %v382_v49 = vadd.f32 %v579_v46, %v374_v47 }
 0x187   :  { %805 = vmatmul.mubr.f32.vlgmr.msra.gmra.mrb[2].mxu1 %v382_v49 }
 0x25a   :  { %v465_v0 = vpop.f32.mrb[2].mxu1 }
 0x25b   :  { %v469_v50 = vsub.f32 %v382_v49, %v465_v0  ;;  %v806_v51 = vpop.f32.mrb[3].mxu1 }
 0x25d   :  { %v470_v52 = vmul.f32 %v469_v50, %v469_v50 }
 0x25f   :  { %840 = vmatmul.mubr.f32.vlgmr.msra.gmra.mrb[4].mxu0 %v470_v52 }
 0x332   :  { %v537_v53 = vpop.f32.mrb[4].mxu0 }
 0x333   :  { %v538_v54 = vadd.f32 1e-05, %v537_v53  ;;  %v841_v55 = vpop.f32.mrb[5].mxu0 }
 0x335   :  { %974 = vrsqrt.f32 %v538_v54 }
 0x33f   :  { %v975_v56 = vpop.eup %974 }
 0x340   :  { %v542_v58 = vmul.f32 %v975_v56, %v469_v50 }
 0x342   :  { %v550_v60 = vmul.f32 %v580_v57, %v542_v58 }
 0x344   :  { %v558_v61 = vadd.f32 %v581_v59, %v550_v60 }
 0x346   :  { %v559_v62 = vmax.f32 %v558_v61, 0.0 }
 0x348   :  { %560 = vst [vmem:[#allocation13] sm:$0xff] %v559_v62 }
 0x349   :  { %1119 = shalt.err (!%p1116_p10)
}
 0x34a   :  { %s1120_s21 = scalar_lea.hbm %s1366_s9, 128 }
 0x34b   :  { %p1121_p11 = scmp.ne.s32.totalorder %s1366_s9, %s1120_s21  ;;  %p1124_p12 = scmp.lt.u32.totalorder %s1120_s21, %s1366_s9 }
 0x34d   :  { %p1126_p13 = pnand %p1124_p12, %p1121_p11 }
 0x34f   :  { %1129 = shalt.err (!%p1126_p13)
}
 0x350   :  { %570 = dma.vmem_to_hbm [thread:$0]  %s568_s18, 128, %s1366_s9, [#allocation4]  }
 0x351   :  { %1138 = dma.done.wait [#allocation4], 128  }
 0x352   :  { %1139 = vsyncadd [#allocation4], 4294967168 }
 0x353   :  { %574 = vsyncpa [#allocation3], 1 }
 0x354   :  { %575 = vsyncpa [#allocation6], 1 }
 0x355   :  { %576 = vsyncpa [#allocation9], 1 }
 0x356   :  { %577 = vsyncpa [#allocation12], 1 }
 0x357   :  { %578 = vsyncpa [#allocation4], 1 }

</bundles_post_ra>
